<compile_context>
chip_gen: v7x
topology: tpu7x:2x2x1
jax: 0.10.0
libtpu: 0.0.40
codegen_flags: <defaults>
</compile_context>

<pallas_src>
import functools

import jax
import jax.numpy as jnp
from jax import lax
from jax.experimental import pallas as pl
from jax.experimental.pallas import tpu as pltpu


def _vmem_budget_bytes():
    """Scoped-VMEM budget: half of physical VMEM, capped at 48 MiB.

    Safe on v5e/v6e (128 MiB physical) and v7x (64 MiB per TensorCore).
    """
    try:
        cap = int(pltpu.get_tpu_info().vmem_capacity_bytes)
    except Exception:  # conservative fallback: assume the smallest (v7x per-TC)
        cap = 64 * 1024 * 1024
    return min(cap // 2, 48 * 1024 * 1024)


def _pick_block_rows(rows, d, itemsize):
    """Largest row tile that fits the VMEM budget.

    Accounts for double-buffered in/out blocks plus ~3 full-tile f32
    temporaries, keeps per-step input traffic around 6 MiB, and caps the tile
    at ~rows/2 so the grid has >= 2 blocks (both v7x TensorCores get work).
    """
    if itemsize >= 4:
        align = 8
    elif itemsize == 2:
        align = 16
    else:
        align = 32
    if rows <= align:
        return rows  # single tiny block; full-dim block shape is always legal

    # VMEM bytes per block row: 2x double-buffered input + 2x output blocks
    # plus ~3 f32 full-tile temporaries (x_f32, diff, pre-cast out).
    per_row = 4 * d * itemsize + 3 * d * 4
    max_rows = max(align, (_vmem_budget_bytes() // per_row) // align * align)

    # ~6 MiB of input per step amortizes the ~0.35 us/step overhead on all
    # generations while leaving VMEM headroom.
    traffic_rows = max(align, ((6 << 20) // max(d * itemsize, 1)) // align * align)
    max_rows = min(max_rows, traffic_rows)

    # >= 2 grid blocks so dimension_semantics=("parallel",) can shard across
    # v7x's 2 TensorCores (no effect on v5e/v6e correctness or perf).
    half_rows = max(align, (((rows + 1) // 2 + align - 1) // align) * align)
    max_rows = min(max_rows, half_rows)

    # Never exceed the aligned-down row count; the ragged remainder is handled
    # by the masked last grid block (no HBM pad).
    return min(max_rows, max(align, (rows // align) * align))


def _layernorm_kernel(x_ref, gamma_ref, beta_ref, o_ref, *, eps):
    """Generic path: one logical row per tile row (d >= 128 or fallback)."""
    x = x_ref[...].astype(jnp.float32)                       # (block_rows, d)
    d = x.shape[-1]
    mean = jnp.mean(x, axis=-1, keepdims=True)                # (block_rows, 1)
    diff = x - mean
    # torch.std default: unbiased (Bessel, N-1); eps is added to std.
    var = jnp.sum(diff * diff, axis=-1, keepdims=True) * (1.0 / max(d - 1, 1))
    inv = pl.reciprocal(jnp.sqrt(var) + eps, approx=False)    # (block_rows, 1)
    out = diff * inv * gamma_ref[...] + beta_ref[...]
    o_ref[...] = out.astype(o_ref.dtype)


def _layernorm_folded_kernel(x_ref, gamma_ref, beta_ref, seg_ref, o_ref, *, eps, d):
    """Lane-dense path for d < 128.

    Each 128-lane tile row holds 128//d logical rows.  Segmented lane sums are
    computed with a block-diagonal ones matrix on the MXU (HIGHEST precision
    keeps f32 accuracy); the matmul also broadcasts the per-segment statistics
    back to every lane of the segment, so the elementwise apply and the output
    store are full lane width (no masked vst.msk).
    """
    x = x_ref[...].astype(jnp.float32)                        # (block_rows, 128)
    seg = seg_ref[...]                                        # (128, 128)
    mean = jnp.dot(x, seg, preferred_element_type=jnp.float32,
                   precision=lax.Precision.HIGHEST) * (1.0 / d)
    diff = x - mean
    var = jnp.dot(diff * diff, seg, preferred_element_type=jnp.float32,
                  precision=lax.Precision.HIGHEST) * (1.0 / max(d - 1, 1))
    inv = pl.reciprocal(jnp.sqrt(var) + eps, approx=False)
    out = diff * inv * gamma_ref[...] + beta_ref[...]
    o_ref[...] = out.astype(o_ref.dtype)


def layer_norm(x, gamma, beta, eps=1e-6):
    """LayerNorm over the last axis of x (any leading dims)."""
    orig_shape = x.shape
    d = orig_shape[-1]
    x2 = x.reshape(-1, d)
    rows = x2.shape[0]
    itemsize = jnp.dtype(x.dtype).itemsize

    # Lane-dense repack for small d: fold 128//d logical rows into one 128-lane
    # tile row.  Logical rows never straddle the 128-lane boundary because
    # 128 % d == 0.  Fall back to the generic path if rows don't fold evenly
    # (still correct, just masked partial stores in that case).
    fold = 128 // d if (0 < d < 128 and 128 % d == 0) else 1
    use_fold = fold > 1 and rows % fold == 0

    if use_fold:
        rows_k, d_k = rows // fold, 128
        x_k = x2.reshape(rows_k, d_k)
        gamma_k = jnp.tile(gamma.astype(jnp.float32).reshape(-1), fold).reshape(1, d_k)
        beta_k = jnp.tile(beta.astype(jnp.float32).reshape(-1), fold).reshape(1, d_k)
        seg_id = jnp.arange(d_k) // d
        seg = (seg_id[:, None] == seg_id[None, :]).astype(jnp.float32)  # (128, 128)
        kernel = functools.partial(_layernorm_folded_kernel, eps=eps, d=d)
        operands = (x_k, gamma_k, beta_k, seg)
        extra_in_specs = [pl.BlockSpec((d_k, d_k), lambda i: (0, 0))]
    else:
        rows_k, d_k = rows, d
        x_k = x2
        gamma_k = gamma.astype(jnp.float32).reshape(1, d_k)
        beta_k = beta.astype(jnp.float32).reshape(1, d_k)
        kernel = functools.partial(_layernorm_kernel, eps=eps)
        operands = (x_k, gamma_k, beta_k)
        extra_in_specs = []

    block_rows = _pick_block_rows(rows_k, d_k, itemsize)
    grid = (pl.cdiv(rows_k, block_rows),)   # ragged last block is masked; no pad

    out = pl.pallas_call(
        kernel,
        out_shape=jax.ShapeDtypeStruct((rows_k, d_k), x.dtype),
        grid_spec=pltpu.PrefetchScalarGridSpec(
            num_scalar_prefetch=0,
            grid=grid,
            in_specs=[
                pl.BlockSpec((block_rows, d_k), lambda i: (i, 0)),
                pl.BlockSpec((1, d_k), lambda i: (0, 0)),
                pl.BlockSpec((1, d_k), lambda i: (0, 0)),
            ] + extra_in_specs,
            out_specs=pl.BlockSpec((block_rows, d_k), lambda i: (i, 0)),
        ),
        compiler_params=pltpu.CompilerParams(
            dimension_semantics=("parallel",),
            vmem_limit_bytes=_vmem_budget_bytes(),
        ),
    )(*operands)

    return out.reshape(orig_shape)


def _reference(x, gamma, beta, eps):
    d = x.shape[-1]
    mean = jnp.mean(x, axis=-1, keepdims=True)
    std = jnp.sqrt(jnp.sum((x - mean) ** 2, axis=-1, keepdims=True) / (d - 1))
    return gamma * (x - mean) / (std + eps) + beta


if __name__ == "__main__":
    key = jax.random.PRNGKey(0)
    k1, k2 = jax.random.split(key)
    ln = jax.jit(layer_norm, static_argnames=("eps",))

    # Case 1: small d_model — exercises the lane-dense folded path
    # (128 // 32 = 4 logical rows per 128-lane tile row).
    batch, seq, d_model = 2, 16, 32
    x1 = jax.random.normal(k1, (batch, seq, d_model), dtype=jnp.float32)
    gamma1 = jnp.ones((d_model,), dtype=jnp.float32)   # nn.Parameter(torch.ones)
    beta1 = jnp.zeros((d_model,), dtype=jnp.float32)   # nn.Parameter(torch.zeros)
    out1 = jax.block_until_ready(ln(x1, gamma1, beta1, eps=1e-6))
    ref1 = _reference(x1, gamma1, beta1, 1e-6)
    assert jnp.allclose(out1, ref1, atol=1e-5, rtol=1e-5), "mismatch (folded path)"

    # Case 2: lane-wide d_model with a ragged row count — exercises the generic
    # path and the masked last grid block (no HBM pad/slice round trip).
    batch2, seq2, d_model2 = 2, 9, 256
    x2 = jax.random.normal(k2, (batch2, seq2, d_model2), dtype=jnp.float32)
    gamma2 = jnp.ones((d_model2,), dtype=jnp.float32)
    beta2 = jnp.zeros((d_model2,), dtype=jnp.float32)
    out2 = jax.block_until_ready(ln(x2, gamma2, beta2, eps=1e-6))
    ref2 = _reference(x2, gamma2, beta2, 1e-6)
    assert jnp.allclose(out2, ref2, atol=1e-5, rtol=1e-5), "mismatch (generic path)"

    print("KERNEL_OK")
</pallas_src>

<mosaic_0001>
module attributes {stable_mosaic.version = 11 : i64} {
  func.func @_layernorm_folded_kernel(%arg0: i32, %arg1: memref<8x128xf32, #tpu.memory_space<vmem>>, %arg2: memref<1x128xf32, #tpu.memory_space<vmem>>, %arg3: memref<1x128xf32, #tpu.memory_space<vmem>>, %arg4: memref<128x128xf32, #tpu.memory_space<vmem>>, %arg5: memref<8x128xf32, #tpu.memory_space<vmem>>) attributes {dimension_semantics = [#tpu.dimension_semantics<parallel>], iteration_bounds = array<i64: 1>, scalar_prefetch = 0 : i64, scratch_operands = 0 : i64, tpu.core_type = #tpu.core_type<tc>, window_params = [{transform_indices = @transform_0, window_bounds = array<i64: 8, 128>}, {pipeline_mode = #tpu.pipeline_mode<synchronous>, transform_indices = @transform_1, window_bounds = array<i64: 1, 128>}, {pipeline_mode = #tpu.pipeline_mode<synchronous>, transform_indices = @transform_2, window_bounds = array<i64: 1, 128>}, {pipeline_mode = #tpu.pipeline_mode<synchronous>, transform_indices = @transform_3, window_bounds = array<i64: 128, 128>}, {transform_indices = @transform_4, window_bounds = array<i64: 8, 128>}]} {
    %c0 = arith.constant 0 : index
    %c0_0 = arith.constant 0 : index
    %0 = vector.load %arg1[%c0, %c0_0] : memref<8x128xf32, #tpu.memory_space<vmem>>, vector<8x128xf32>
    %c0_1 = arith.constant 0 : index
    %c0_2 = arith.constant 0 : index
    %1 = vector.load %arg4[%c0_1, %c0_2] : memref<128x128xf32, #tpu.memory_space<vmem>>, vector<128x128xf32>
    %cst = arith.constant dense<0.000000e+00> : vector<8x128xf32>
    %2 = tpu.matmul %0, %1, %cst {dimension_numbers = #tpu.dot_dimension_numbers<[1], [0], [0], [1], [0, 0, 1, 1], [], []>, precision = #tpu.contract_precision<fp32>} : vector<8x128xf32>, vector<128x128xf32>, vector<8x128xf32> -> vector<8x128xf32>
    %cst_3 = arith.constant 3.125000e-02 : f32
    %3 = vector.broadcast %cst_3 : f32 to vector<8x128xf32>
    %4 = arith.mulf %2, %3 : vector<8x128xf32>
    %5 = arith.subf %0, %4 : vector<8x128xf32>
    %6 = arith.mulf %5, %5 : vector<8x128xf32>
    %cst_4 = arith.constant dense<0.000000e+00> : vector<8x128xf32>
    %7 = tpu.matmul %6, %1, %cst_4 {dimension_numbers = #tpu.dot_dimension_numbers<[1], [0], [0], [1], [0, 0, 1, 1], [], []>, precision = #tpu.contract_precision<fp32>} : vector<8x128xf32>, vector<128x128xf32>, vector<8x128xf32> -> vector<8x128xf32>
    %cst_5 = arith.constant 0.0322580636 : f32
    %8 = vector.broadcast %cst_5 : f32 to vector<8x128xf32>
    %9 = arith.mulf %7, %8 : vector<8x128xf32>
    %10 = math.sqrt %9 : vector<8x128xf32>
    %cst_6 = arith.constant 9.99999997E-7 : f32
    %11 = vector.broadcast %cst_6 : f32 to vector<8x128xf32>
    %12 = arith.addf %10, %11 : vector<8x128xf32>
    %13 = tpu.reciprocal %12 : vector<8x128xf32> -> vector<8x128xf32>
    %14 = arith.mulf %5, %13 : vector<8x128xf32>
    %c0_7 = arith.constant 0 : index
    %c0_8 = arith.constant 0 : index
    %15 = vector.load %arg2[%c0_7, %c0_8] : memref<1x128xf32, #tpu.memory_space<vmem>>, vector<1x128xf32>
    %16 = vector.broadcast %15 : vector<1x128xf32> to vector<8x128xf32>
    %17 = arith.mulf %14, %16 : vector<8x128xf32>
    %c0_9 = arith.constant 0 : index
    %c0_10 = arith.constant 0 : index
    %18 = vector.load %arg3[%c0_9, %c0_10] : memref<1x128xf32, #tpu.memory_space<vmem>>, vector<1x128xf32>
    %19 = vector.broadcast %18 : vector<1x128xf32> to vector<8x128xf32>
    %20 = arith.addf %17, %19 : vector<8x128xf32>
    %c0_11 = arith.constant 0 : index
    %c0_12 = arith.constant 0 : index
    %21 = vector.load %arg5[%c0_11, %c0_12] : memref<8x128xf32, #tpu.memory_space<vmem>>, vector<8x128xf32>
    tpu.vector_store %arg5[%c0_11, %c0_12], %20 {strides = array<i32>} : memref<8x128xf32, #tpu.memory_space<vmem>>, vector<8x128xf32>,
    return
  }
  func.func @transform_0(%arg0: i32) -> (i32, i32) {
    %c0_i32 = arith.constant 0 : i32
    %c0_i32_0 = arith.constant 0 : i32
    return %arg0, %c0_i32 : i32, i32
  }
  func.func @transform_1(%arg0: i32) -> (i32, i32) {
    %c0_i32 = arith.constant 0 : i32
    %c0_i32_0 = arith.constant 0 : i32
    %c0_i32_1 = arith.constant 0 : i32
    return %c0_i32, %c0_i32_0 : i32, i32
  }
  func.func @transform_2(%arg0: i32) -> (i32, i32) {
    %c0_i32 = arith.constant 0 : i32
    %c0_i32_0 = arith.constant 0 : i32
    %c0_i32_1 = arith.constant 0 : i32
    return %c0_i32, %c0_i32_0 : i32, i32
  }
  func.func @transform_3(%arg0: i32) -> (i32, i32) {
    %c0_i32 = arith.constant 0 : i32
    %c0_i32_0 = arith.constant 0 : i32
    %c0_i32_1 = arith.constant 0 : i32
    return %c0_i32, %c0_i32_0 : i32, i32
  }
  func.func @transform_4(%arg0: i32) -> (i32, i32) {
    %c0_i32 = arith.constant 0 : i32
    %c0_i32_0 = arith.constant 0 : i32
    return %arg0, %c0_i32 : i32, i32
  }
}

</mosaic_0001>

<bundles_post_ra>
// kernel: tile.13
= control target key start
LH: loop header
LB: loop body
LE: loop exit
PB: predicated region body
PF: predicated region fallthrough
CT: control target
= control target key end

     0   :  { %s22_s0 = inlined_call_operand.vmem [shape: f32[32], index: 0, kind: input, shape index: {}]   ;;  %s23_s1 = inlined_call_operand.vmem [shape: f32[4,32], index: 1, kind: output, shape index: {}]  }
   0x1   :  { %v4_v0 = vld [vmem:[%s22_s0] ss:$0 sm:$0xff] }
   0x2   :  { %5 = vst [vmem:[%s23_s1] sm:$0xf] %v4_v0 }

// kernel: tile.14
= control target key start
LH: loop header
LB: loop body
LE: loop exit
PB: predicated region body
PF: predicated region fallthrough
CT: control target
= control target key end

     0   :  { %vm7_vm0 = vcmask 261120   ;;  %s37_s8 = smov 32   ;;  %s38_s9 = smov 64   ;;  %vm13_vm1 = vcmask 1048320   ;;  %vm19_vm2 = vcmask 785920   ;;  %vm25_vm3 = vcmask 523520   ;;  %s55_s0 = inlined_call_operand.vmem [shape: f32[4,32], index: 0, kind: input, shape index: {}]   ;;  %s56_s1 = inlined_call_operand.vmem [shape: f32[1,128], index: 1, kind: output, shape index: {}]  }
   0x1   :  { %v4_v0 = vld [vmem:[%s55_s0] sm:$0xf]  ;;  %s36_s0 = smov 96  }
   0x2   :  { %5 = vst [vmem:[#allocation1] sm:$0xf] %v4_v0 }
   0x9   :  { %v10_v1 = vld [vmem:[#allocation1 + $0x3] sm:$0x1]   ;;  %v22_v2 = vld [vmem:[#allocation1 + $0x1] sm:$0x1]   ;;  %v6_v3 = vld [vmem:[#allocation1] sm:$0x1]  }
   0xa   :  { %11 = vrot.lane.b32.xlu0 %v10_v1, %s36_s0  ;;  %23 = vrot.lane.b32.xlu1 %v22_v2, %s37_s8  ;;  %v16_v4 = vld [vmem:[#allocation1 + $0x2] sm:$0x1]   ;;  %8 = vst.msk [vmem:[#allocation0] sm:$0x1] %vm7_vm0, %v6_v3  }
   0xe   :  { %17 = vrot.lane.b32.xlu0 %v16_v4, %s38_s9 }
  0x7c   :  { %v12_v5 = vpop.permute.xlu0 %11   ;;  %v24_v6 = vpop.permute.xlu1 %23  }
  0x7d   :  { %14 = vst.msk [vmem:[#allocation0] sm:$0x1] %vm13_vm1, %v12_v5  }
  0x80   :  { %v18_v7 = vpop.permute.xlu0 %17  }
  0x81   :  { %20 = vst.msk [vmem:[#allocation0] sm:$0x1] %vm19_vm2, %v18_v7  }
  0x82   :  { %26 = vst.msk [vmem:[#allocation0] sm:$0x1] %vm25_vm3, %v24_v6  }
  0x89   :  { %v30_v8 = vld [vmem:[#allocation0] sm:$0x1] }
  0x8a   :  { %32 = vst [vmem:[%s56_s1] sm:$0x1] %v30_v8 }

// kernel: layer_norm.1
= control target key start
LH: loop header
LB: loop body
LE: loop exit
PB: predicated region body
PF: predicated region fallthrough
CT: control target
= control target key end

     0   :  { %v2292_v0 = vmov 0.0|0.0   ;;  %vm2293_vm0 = vmmov 0   ;;  %v2294_v4 = vmov 0.0   ;;  %s2771_s3 = inlined_call_operand.vmem [shape: f32[128,128], index: 3, kind: input, shape index: {}]   ;;  %s2772_s0 = inlined_call_operand.vmem [shape: f32[8,128], index: 0, kind: input, shape index: {}]   ;;  %s2773_s1 = inlined_call_operand.vmem [shape: f32[1,128], index: 1, kind: input, shape index: {}]   ;;  %s2774_s2 = inlined_call_operand.vmem [shape: f32[1,128], index: 2, kind: input, shape index: {}]   ;;  %s2775_s4 = inlined_call_operand.vmem [shape: f32[8,128], index: 4, kind: output, shape index: {}]  }
   0x1   :  { %1977 = vmatprep.subr.bf16.mxu0 %v2292_v0  ;;  %v18_v1 = vld [vmem:[%s2771_s3] sm:$0xff]  ;;  %v19_v2 = vld [vmem:[%s2771_s3 + $0x8] sm:$0xff]  ;;  %v20_v3 = vld [vmem:[%s2771_s3 + $0x10] sm:$0xff]  ;;  %1589 = vmatprep.mubr.msk.f32.mxu0 %vm2293_vm0, %v2294_v4 }
   0x2   :  { %v35_v5 = vand.u32 4294901760, %v18_v1  ;;  %v38_v6 = vand.u32 4294901760, %v19_v2  ;;  %v21_v7 = vld [vmem:[%s2771_s3 + $0x18] sm:$0xff]  ;;  %v41_v8 = vand.u32 4294901760, %v20_v3  ;;  %2121 = vmatprep.subr.bf16.mxu1 %v2292_v0  ;;  %1799 = vmatprep.mubr.msk.f32.mxu1 %vm2293_vm0, %v2294_v4  ;;  %v22_v10 = vld [vmem:[%s2771_s3 + $0x20] sm:$0xff]  ;;  %v23_v11 = vld [vmem:[%s2771_s3 + $0x28] sm:$0xff] }
   0x3   :  { %v44_v9 = vand.u32 4294901760, %v21_v7  ;;  %v47_v14 = vand.u32 4294901760, %v22_v10  ;;  %v50_v15 = vand.u32 4294901760, %v23_v11  ;;  %v24_v16 = vld [vmem:[%s2771_s3 + $0x30] sm:$0xff]  ;;  %v25_v17 = vld [vmem:[%s2771_s3 + $0x38] sm:$0xff]  ;;  %v26_v21 = vld [vmem:[%s2771_s3 + $0x40] sm:$0xff] }
   0x4   :  { %v2344_v12 = vpack.c.bf16 %v38_v6, %v35_v5  ;;  %v53_v19 = vand.u32 4294901760, %v24_v16  ;;  %v56_v20 = vand.u32 4294901760, %v25_v17  ;;  %v2367_v22 = vld [vmem:[%s2772_s0] sm:$0xff]  ;;  %v27_v23 = vld [vmem:[%s2771_s3 + $0x48] sm:$0xff]  ;;  %v28_v24 = vld [vmem:[%s2771_s3 + $0x50] sm:$0xff]  ;;  %v59_v27 = vand.u32 4294901760, %v26_v21 }
   0x5   :  { %v2347_v13 = vpack.c.bf16 %v44_v9, %v41_v8  ;;  %v2359_v18 = vpack.c.bf16 %v50_v15, %v47_v14  ;;  %v29_v25 = vld [vmem:[%s2771_s3 + $0x58] sm:$0xff]  ;;  %v30_v26 = vld [vmem:[%s2771_s3 + $0x60] sm:$0xff]  ;;  %v31_v28 = vld [vmem:[%s2771_s3 + $0x68] sm:$0xff]  ;;  %v2394_v31 = vand.u32 4294901760, %v2367_v22  ;;  %v62_v33 = vand.u32 4294901760, %v27_v23 }
   0x6   :  { %1979 = vmatpush3.bf16.msra.mxu0 %v2344_v12  ;;  %2123 = vmatpush3.bf16.msra.mxu1 %v2344_v12  ;;  %v32_v29 = vld [vmem:[%s2771_s3 + $0x70] sm:$0xff]  ;;  %v33_v30 = vld [vmem:[%s2771_s3 + $0x78] sm:$0xff]  ;;  %v2397_v32 = vpack.c.bf16 %v56_v20, %v53_v19  ;;  %v2399_v34 = vsub.f32 %v18_v1, %v35_v5  ;;  %v2401_v35 = vsub.f32 %v19_v2, %v38_v6  ;;  %v65_v36 = vand.u32 4294901760, %v28_v24 }
   0x7   :  { %1980 = vmatprep.subr.bf16.mxu0 %v2292_v0  ;;  %2124 = vmatprep.subr.bf16.mxu1 %v2292_v0  ;;  %v68_v37 = vand.u32 4294901760, %v29_v25  ;;  %v71_v38 = vand.u32 4294901760, %v30_v26  ;;  %v74_v39 = vand.u32 4294901760, %v31_v28  ;;  %v77_v40 = vand.u32 4294901760, %v32_v29 }
   0x8   :  { %v80_v41 = vand.u32 4294901760, %v33_v30  ;;  %v2408_v42 = vsub.f32 %v2367_v22, %v2394_v31  ;;  %v2410_v43 = vsub.f32 %v20_v3, %v41_v8  ;;  %v2413_v44 = vpack.c.bf16 %v62_v33, %v59_v27 }
   0x9   :  { %v128_v45 = vand.u32 4294901760, %v2399_v34  ;;  %v135_v46 = vand.u32 4294901760, %v2401_v35  ;;  %v2417_v47 = vsub.f32 %v21_v7, %v44_v9  ;;  %v2421_v48 = vsub.f32 %v22_v10, %v47_v14 }
   0xa   :  { %1982 = vmatpush3.bf16.msra.mxu0 %v2347_v13  ;;  %2126 = vmatpush3.bf16.msra.mxu1 %v2347_v13  ;;  %v2424_v49 = vpack.c.bf16 %v68_v37, %v65_v36  ;;  %v2426_v50 = vpack.c.bf16 %v74_v39, %v71_v38  ;;  %v2428_v51 = vpack.c.bf16 %v80_v41, %v77_v40  ;;  %v117_v52 = vand.u32 4294901760, %v2408_v42 }
   0xb   :  { %1983 = vmatprep.subr.bf16.mxu0 %v2292_v0  ;;  %2127 = vmatprep.subr.bf16.mxu1 %v2292_v0  ;;  %v142_v53 = vand.u32 4294901760, %v2410_v43  ;;  %v2432_v54 = vsub.f32 %v23_v11, %v50_v15  ;;  %v2434_v55 = vsub.f32 %v24_v16, %v53_v19  ;;  %v129_v56 = vsub.f32 %v2399_v34, %v128_v45 }
   0xc   :  { %v136_v57 = vsub.f32 %v2401_v35, %v135_v46  ;;  %v149_v58 = vand.u32 4294901760, %v2417_v47  ;;  %v2440_v59 = vsub.f32 %v25_v17, %v56_v20  ;;  %v156_v60 = vand.u32 4294901760, %v2421_v48 }
   0xd   :  { %v2445_v61 = vsub.f32 %v26_v21, %v59_v27  ;;  %v2447_v62 = vsub.f32 %v27_v23, %v62_v33  ;;  %v2449_v63 = vsub.f32 %v28_v24, %v65_v36  ;;  %v2452_v1 = vsub.f32 %v29_v25, %v68_v37 }
   0xe   :  { %1985 = vmatpush3.bf16.msra.mxu0 %v2359_v18  ;;  %2129 = vmatpush3.bf16.msra.mxu1 %v2359_v18  ;;  %v2454_v2 = vsub.f32 %v30_v26, %v71_v38  ;;  %v2456_v3 = vsub.f32 %v31_v28, %v74_v39  ;;  %v2458_v5 = vsub.f32 %v32_v29, %v77_v40  ;;  %v163_v8 = vand.u32 4294901760, %v2432_v54 }
   0xf   :  { %1986 = vmatprep.subr.bf16.mxu0 %v2292_v0  ;;  %2130 = vmatprep.subr.bf16.mxu1 %v2292_v0  ;;  %v118_v6 = vsub.f32 %v2408_v42, %v117_v52  ;;  %v143_v7 = vsub.f32 %v2410_v43, %v142_v53  ;;  %v2465_v9 = vsub.f32 %v33_v30, %v80_v41  ;;  %v130_v10 = vand.u32 4294901760, %v129_v56 }
  0x10   :  { %v137_v11 = vand.u32 4294901760, %v136_v57  ;;  %v150_v14 = vsub.f32 %v2417_v47, %v149_v58  ;;  %v170_v15 = vand.u32 4294901760, %v2434_v55  ;;  %v177_v16 = vand.u32 4294901760, %v2440_v59 }
  0x11   :  { %v184_v17 = vand.u32 4294901760, %v2445_v61  ;;  %v191_v19 = vand.u32 4294901760, %v2447_v62  ;;  %v198_v20 = vand.u32 4294901760, %v2449_v63  ;;  %v205_v21 = vand.u32 4294901760, %v2452_v1 }
  0x12   :  { %1988 = vmatpush3.bf16.msra.mxu0 %v2397_v32  ;;  %2132 = vmatpush3.bf16.msra.mxu1 %v2397_v32  ;;  %v212_v23 = vand.u32 4294901760, %v2454_v2  ;;  %v219_v24 = vand.u32 4294901760, %v2456_v3  ;;  %v226_v25 = vand.u32 4294901760, %v2458_v5  ;;  %v233_v26 = vand.u32 4294901760, %v2465_v9 }
  0x13   :  { %1989 = vmatprep.subr.bf16.mxu0 %v2292_v0  ;;  %2133 = vmatprep.subr.bf16.mxu1 %v2292_v0  ;;  %v2482_v27 = vpack.c.bf16 %v135_v46, %v128_v45  ;;  %v2484_v28 = vpack.c.bf16 %v149_v58, %v142_v53  ;;  %v2486_v29 = vpack.c.bf16 %v163_v8, %v156_v60  ;;  %v119_v39 = vand.u32 4294901760, %v118_v6 }
  0x14   :  { %v2489_v30 = vpack.c.bf16 %v177_v16, %v170_v15  ;;  %v2491_v33 = vpack.c.bf16 %v191_v19, %v184_v17  ;;  %v2493_v36 = vpack.c.bf16 %v205_v21, %v198_v20  ;;  %v2495_v37 = vpack.c.bf16 %v219_v24, %v212_v23 }
  0x15   :  { %v2498_v38 = vpack.c.bf16 %v233_v26, %v226_v25  ;;  %v157_v40 = vsub.f32 %v2421_v48, %v156_v60  ;;  %v2504_v41 = vpack.c.bf16 %v137_v11, %v130_v10  ;;  %v144_v45 = vand.u32 4294901760, %v143_v7 }
  0x16   :  { %1991 = vmatpush3.bf16.msra.mxu0 %v2413_v44  ;;  %2135 = vmatpush3.bf16.msra.mxu1 %v2413_v44  ;;  %v151_v46 = vand.u32 4294901760, %v150_v14  ;;  %v164_v53 = vsub.f32 %v2432_v54, %v163_v8  ;;  %v171_v56 = vsub.f32 %v2434_v55, %v170_v15  ;;  %v178_v6 = vsub.f32 %v2440_v59, %v177_v16 }
  0x17   :  { %1992 = vmatprep.subr.bf16.mxu0 %v2292_v0  ;;  %2136 = vmatprep.subr.bf16.mxu1 %v2292_v0  ;;  %v158_v58 = vand.u32 4294901760, %v157_v40  ;;  %v185_v11 = vsub.f32 %v2445_v61, %v184_v17  ;;  %v192_v14 = vsub.f32 %v2447_v62, %v191_v19  ;;  %v199_v15 = vsub.f32 %v2449_v63, %v198_v20 }
  0x18   :  { %v2512_v57 = vpack.c.bf16 %v151_v46, %v144_v45  ;;  %v165_v60 = vand.u32 4294901760, %v164_v53  ;;  %v172_v7 = vand.u32 4294901760, %v171_v56  ;;  %v179_v10 = vand.u32 4294901760, %v178_v6 }
  0x19   :  { %v193_v40 = vand.u32 4294901760, %v192_v14  ;;  %v206_v45 = vsub.f32 %v2452_v1, %v205_v21  ;;  %v213_v46 = vsub.f32 %v2454_v2, %v212_v23  ;;  %v200_v19 = vand.u32 4294901760, %v199_v15 }
  0x1a   :  { %1994 = vmatpush3.bf16.msra.mxu0 %v2424_v49  ;;  %2138 = vmatpush3.bf16.msra.mxu1 %v2424_v49  ;;  %v2519_v8 = vpack.c.bf16 %v165_v60, %v158_v58  ;;  %v2526_v16 = vpack.c.bf16 %v179_v10, %v172_v7  ;;  %v220_v20 = vsub.f32 %v2456_v3, %v219_v24 }
  0x1b   :  { %1995 = vmatprep.subr.bf16.mxu0 %v2292_v0  ;;  %2139 = vmatprep.subr.bf16.mxu1 %v2292_v0  ;;  %v207_v53 = vand.u32 4294901760, %v206_v45  ;;  %v227_v56 = vsub.f32 %v2458_v5, %v226_v25  ;;  %v214_v21 = vand.u32 4294901760, %v213_v46  ;;  %v234_v23 = vsub.f32 %v2465_v9, %v233_v26 }
  0x1c   :  { %v221_v60 = vand.u32 4294901760, %v220_v20  ;;  %v2553_v26 = vpack.c.bf16 %v2401_v35, %v2399_v34  ;;  %v2560_v10 = vpack.c.bf16 %v2417_v47, %v2410_v43  ;;  %v2568_v34 = vpack.c.bf16 %v2432_v54, %v2421_v48 }
  0x1d   :  { %v2538_v58 = vpack.c.bf16 %v207_v53, %v200_v19  ;;  %v228_v7 = vand.u32 4294901760, %v227_v56  ;;  %v235_v24 = vand.u32 4294901760, %v234_v23  ;;  %v2574_v35 = vpack.c.bf16 %v2440_v59, %v2434_v55 }
  0x1e   :  { %1997 = vmatpush3.bf16.msra.mxu0 %v2426_v50  ;;  %2141 = vmatpush3.bf16.msra.mxu1 %v2426_v50  ;;  %v2543_v6 = vpack.c.bf16 %v221_v60, %v214_v21  ;;  %v2580_v43 = vpack.c.bf16 %v2447_v62, %v2445_v61  ;;  %v2586_v47 = vpack.c.bf16 %v2452_v1, %v2449_v63 }
  0x1f   :  { %1998 = vmatprep.subr.bf16.mxu0 %v2292_v0  ;;  %2142 = vmatprep.subr.bf16.mxu1 %v2292_v0  ;;  %v2547_v25 = vpack.c.bf16 %v235_v24, %v228_v7  ;;  %v2592_v48 = vpack.c.bf16 %v2456_v3, %v2454_v2  ;;  %v2598_v54 = vpack.c.bf16 %v2465_v9, %v2458_v5  ;;  %v1352_v5 = vld [vmem:[%s2774_s2] ss:$0 sm:$0xff] }
  0x22   :  { %2000 = vmatpush3.bf16.msra.mxu0 %v2428_v51  ;;  %2144 = vmatpush3.bf16.msra.mxu1 %v2428_v51 }
  0x23   :  { %2001 = vmatprep.subr.bf16.mxu0 %v2292_v0  ;;  %2145 = vmatprep.subr.bf16.mxu1 %v2292_v0 }
  0x25   :  { %1590 = vmatmul.mubr.f32.vlgmr.msra.gmra.mrb[0].mxu0 %v119_v39  ;;  %v186_v39 = vand.u32 4294901760, %v185_v11 }
  0x26   :  { %2003 = vmatpush3.bf16.msra.mxu0 %v2504_v41  ;;  %1624 = vmatprep.mubr.msk.f32.mxu0 %vm2293_vm0, %v2294_v4 }
  0x27   :  { %2004 = vmatprep.subr.bf16.mxu0 %v2292_v0  ;;  %v2532_v17 = vpack.c.bf16 %v193_v40, %v186_v39 }
  0x2a   :  { %2006 = vmatpush3.bf16.msra.mxu0 %v2512_v57 }
  0x2b   :  { %2007 = vmatprep.subr.bf16.mxu0 %v2292_v0 }
  0x2e   :  { %2009 = vmatpush3.bf16.msra.mxu0 %v2519_v8 }
  0x2f   :  { %2010 = vmatprep.subr.bf16.mxu0 %v2292_v0 }
  0x32   :  { %2012 = vmatpush3.bf16.msra.mxu0 %v2526_v16 }
  0x33   :  { %2013 = vmatprep.subr.bf16.mxu0 %v2292_v0 }
  0x36   :  { %2015 = vmatpush3.bf16.msra.mxu0 %v2532_v17 }
  0x37   :  { %2016 = vmatprep.subr.bf16.mxu0 %v2292_v0 }
  0x3a   :  { %2018 = vmatpush3.bf16.msra.mxu0 %v2538_v58 }
  0x3b   :  { %2019 = vmatprep.subr.bf16.mxu0 %v2292_v0 }
  0x3e   :  { %2021 = vmatpush3.bf16.msra.mxu0 %v2543_v6 }
  0x3f   :  { %2022 = vmatprep.subr.bf16.mxu0 %v2292_v0 }
  0x42   :  { %2024 = vmatpush3.bf16.msra.mxu0 %v2547_v25 }
  0x43   :  { %2025 = vmatprep.subr.bf16.mxu0 %v2292_v0 }
  0x45   :  { %1625 = vmatmul.mubr.f32.vlgmr.msra.gmra.mrb[0].mxu0 %v2394_v31 }
  0x46   :  { %2027 = vmatpush3.bf16.msra.mxu0 %v2553_v26  ;;  %1659 = vmatprep.mubr.msk.f32.mxu0 %vm2293_vm0, %v2294_v4 }
  0x47   :  { %2028 = vmatprep.subr.bf16.mxu0 %v2292_v0 }
  0x4a   :  { %2030 = vmatpush3.bf16.msra.mxu0 %v2560_v10 }
  0x4b   :  { %2031 = vmatprep.subr.bf16.mxu0 %v2292_v0 }
  0x4e   :  { %2033 = vmatpush3.bf16.msra.mxu0 %v2568_v34 }
  0x4f   :  { %2034 = vmatprep.subr.bf16.mxu0 %v2292_v0 }
  0x52   :  { %2036 = vmatpush3.bf16.msra.mxu0 %v2574_v35 }
  0x53   :  { %2037 = vmatprep.subr.bf16.mxu0 %v2292_v0 }
  0x56   :  { %2039 = vmatpush3.bf16.msra.mxu0 %v2580_v43 }
  0x57   :  { %2040 = vmatprep.subr.bf16.mxu0 %v2292_v0 }
  0x5a   :  { %2042 = vmatpush3.bf16.msra.mxu0 %v2586_v47 }
  0x5b   :  { %2043 = vmatprep.subr.bf16.mxu0 %v2292_v0 }
  0x5e   :  { %2045 = vmatpush3.bf16.msra.mxu0 %v2592_v48 }
  0x5f   :  { %2046 = vmatprep.subr.bf16.mxu0 %v2292_v0 }
  0x62   :  { %2048 = vmatpush3.bf16.msra.mxu0 %v2598_v54 }
  0x63   :  { %2049 = vmatprep.subr.bf16.mxu0 %v2292_v0 }
  0x65   :  { %1660 = vmatmul.mubr.f32.vlgmr.msra.gmra.mrb[0].mxu0 %v2408_v42 }
  0x66   :  { %2051 = vmatpush3.bf16.msra.mxu0 %v2344_v12  ;;  %1694 = vmatprep.mubr.msk.f32.mxu0 %vm2293_vm0, %v2294_v4 }
  0x67   :  { %2052 = vmatprep.subr.bf16.mxu0 %v2292_v0 }
  0x6a   :  { %2054 = vmatpush3.bf16.msra.mxu0 %v2347_v13 }
  0x6b   :  { %2055 = vmatprep.subr.bf16.mxu0 %v2292_v0 }
  0x6e   :  { %2057 = vmatpush3.bf16.msra.mxu0 %v2359_v18 }
  0x6f   :  { %2058 = vmatprep.subr.bf16.mxu0 %v2292_v0 }
  0x72   :  { %2060 = vmatpush3.bf16.msra.mxu0 %v2397_v32 }
  0x73   :  { %2061 = vmatprep.subr.bf16.mxu0 %v2292_v0 }
  0x76   :  { %2063 = vmatpush3.bf16.msra.mxu0 %v2413_v44 }
  0x77   :  { %2064 = vmatprep.subr.bf16.mxu0 %v2292_v0 }
  0x7a   :  { %2066 = vmatpush3.bf16.msra.mxu0 %v2424_v49 }
  0x7b   :  { %2067 = vmatprep.subr.bf16.mxu0 %v2292_v0 }
  0x7e   :  { %2069 = vmatpush3.bf16.msra.mxu0 %v2426_v50 }
  0x7f   :  { %2070 = vmatprep.subr.bf16.mxu0 %v2292_v0 }
  0x82   :  { %2072 = vmatpush3.bf16.msra.mxu0 %v2428_v51 }
  0x83   :  { %2073 = vmatprep.subr.bf16.mxu0 %v2292_v0 }
  0x85   :  { %1695 = vmatmul.mubr.f32.vlgmr.msra.gmra.mrb[0].mxu0 %v117_v52 }
  0x86   :  { %2075 = vmatpush3.bf16.msra.mxu0 %v2482_v27  ;;  %1729 = vmatprep.mubr.msk.f32.mxu0 %vm2293_vm0, %v2294_v4 }
  0x87   :  { %2076 = vmatprep.subr.bf16.mxu0 %v2292_v0 }
  0x8a   :  { %2078 = vmatpush3.bf16.msra.mxu0 %v2484_v28 }
  0x8b   :  { %2079 = vmatprep.subr.bf16.mxu0 %v2292_v0 }
  0x8e   :  { %2081 = vmatpush3.bf16.msra.mxu0 %v2486_v29 }
  0x8f   :  { %2082 = vmatprep.subr.bf16.mxu0 %v2292_v0 }
  0x92   :  { %2084 = vmatpush3.bf16.msra.mxu0 %v2489_v30 }
  0x93   :  { %2085 = vmatprep.subr.bf16.mxu0 %v2292_v0 }
  0x96   :  { %2087 = vmatpush3.bf16.msra.mxu0 %v2491_v33 }
  0x97   :  { %2088 = vmatprep.subr.bf16.mxu0 %v2292_v0 }
  0x9a   :  { %2090 = vmatpush3.bf16.msra.mxu0 %v2493_v36 }
  0x9b   :  { %2091 = vmatprep.subr.bf16.mxu0 %v2292_v0 }
  0x9e   :  { %2093 = vmatpush3.bf16.msra.mxu0 %v2495_v37 }
  0x9f   :  { %2094 = vmatprep.subr.bf16.mxu0 %v2292_v0 }
  0xa2   :  { %2096 = vmatpush3.bf16.msra.mxu0 %v2498_v38 }
  0xa3   :  { %2097 = vmatprep.subr.bf16.mxu0 %v2292_v0 }
  0xa5   :  { %1730 = vmatmul.mubr.f32.vlgmr.msra.gmra.mrb[0].mxu0 %v2394_v31 }
  0xa6   :  { %2099 = vmatpush3.bf16.msra.mxu0 %v2344_v12  ;;  %1764 = vmatprep.mubr.msk.f32.mxu0 %vm2293_vm0, %v2294_v4 }
  0xa7   :  { %2100 = vmatprep.subr.bf16.mxu0 %v2292_v0 }
  0xaa   :  { %2102 = vmatpush3.bf16.msra.mxu0 %v2347_v13 }
  0xab   :  { %2103 = vmatprep.subr.bf16.mxu0 %v2292_v0 }
  0xae   :  { %2105 = vmatpush3.bf16.msra.mxu0 %v2359_v18 }
  0xaf   :  { %2106 = vmatprep.subr.bf16.mxu0 %v2292_v0 }
  0xb2   :  { %2108 = vmatpush3.bf16.msra.mxu0 %v2397_v32 }
  0xb3   :  { %2109 = vmatprep.subr.bf16.mxu0 %v2292_v0 }
  0xb6   :  { %2111 = vmatpush3.bf16.msra.mxu0 %v2413_v44 }
  0xb7   :  { %2112 = vmatprep.subr.bf16.mxu0 %v2292_v0 }
  0xba   :  { %2114 = vmatpush3.bf16.msra.mxu0 %v2424_v49 }
  0xbb   :  { %2115 = vmatprep.subr.bf16.mxu0 %v2292_v0 }
  0xbe   :  { %2117 = vmatpush3.bf16.msra.mxu0 %v2426_v50 }
  0xbf   :  { %2118 = vmatprep.subr.bf16.mxu0 %v2292_v0 }
  0xc2   :  { %2120 = vmatpush3.bf16.msra.mxu0 %v2428_v51 }
  0xc5   :  { %1765 = vmatmul.mubr.f32.vlgmr.msra.gmra.mrb[0].mxu0 %v2394_v31 }
 0x198   :  { %v671_v42 = vpop.f32.mrb[0].mxu0 }
 0x199   :  { %v675_v52 = vmul.f32 0.03125, %v671_v42  ;;  %v1766_v55 = vpop.f32.mrb[1].mxu0 }
 0x19b   :  { %v2662_v59 = vsub.f32 %v2367_v22, %v675_v52 }
 0x19d   :  { %v677_v61 = vmul.f32 %v2662_v59, %v2662_v59 }
 0x19f   :  { %v2666_v62 = vand.u32 4294901760, %v677_v61 }
 0x1a1   :  { %v760_v63 = vsub.f32 %v677_v61, %v2666_v62 }
 0x1a3   :  { %v761_v1 = vand.u32 4294901760, %v760_v63 }
 0x1a5   :  { %v762_v2 = vsub.f32 %v760_v63, %v761_v1 }
 0x1a7   :  { %v763_v3 = vand.u32 4294901760, %v762_v2 }
 0x1a9   :  { %1800 = vmatmul.mubr.f32.vlgmr.msra.gmra.mrb[0].mxu1 %v763_v3 }
 0x1aa   :  { %2147 = vmatpush3.bf16.msra.mxu1 %v2504_v41  ;;  %1834 = vmatprep.mubr.msk.f32.mxu1 %vm2293_vm0, %v2294_v4 }
 0x1ab   :  { %2148 = vmatprep.subr.bf16.mxu1 %v2292_v0 }
 0x1ae   :  { %2150 = vmatpush3.bf16.msra.mxu1 %v2512_v57 }
 0x1af   :  { %2151 = vmatprep.subr.bf16.mxu1 %v2292_v0 }
 0x1b2   :  { %2153 = vmatpush3.bf16.msra.mxu1 %v2519_v8 }
 0x1b3   :  { %2154 = vmatprep.subr.bf16.mxu1 %v2292_v0 }
 0x1b6   :  { %2156 = vmatpush3.bf16.msra.mxu1 %v2526_v16 }
 0x1b7   :  { %2157 = vmatprep.subr.bf16.mxu1 %v2292_v0 }
 0x1ba   :  { %2159 = vmatpush3.bf16.msra.mxu1 %v2532_v17 }
 0x1bb   :  { %2160 = vmatprep.subr.bf16.mxu1 %v2292_v0 }
 0x1be   :  { %2162 = vmatpush3.bf16.msra.mxu1 %v2538_v58 }
 0x1bf   :  { %2163 = vmatprep.subr.bf16.mxu1 %v2292_v0 }
 0x1c2   :  { %2165 = vmatpush3.bf16.msra.mxu1 %v2543_v6 }
 0x1c3   :  { %2166 = vmatprep.subr.bf16.mxu1 %v2292_v0 }
 0x1c6   :  { %2168 = vmatpush3.bf16.msra.mxu1 %v2547_v25 }
 0x1c7   :  { %2169 = vmatprep.subr.bf16.mxu1 %v2292_v0 }
 0x1c9   :  { %1835 = vmatmul.mubr.f32.vlgmr.msra.gmra.mrb[0].mxu1 %v2666_v62 }
 0x1ca   :  { %2171 = vmatpush3.bf16.msra.mxu1 %v2553_v26  ;;  %1869 = vmatprep.mubr.msk.f32.mxu1 %vm2293_vm0, %v2294_v4 }
 0x1cb   :  { %2172 = vmatprep.subr.bf16.mxu1 %v2292_v0 }
 0x1ce   :  { %2174 = vmatpush3.bf16.msra.mxu1 %v2560_v10 }
 0x1cf   :  { %2175 = vmatprep.subr.bf16.mxu1 %v2292_v0 }
 0x1d2   :  { %2177 = vmatpush3.bf16.msra.mxu1 %v2568_v34 }
 0x1d3   :  { %2178 = vmatprep.subr.bf16.mxu1 %v2292_v0 }
 0x1d6   :  { %2180 = vmatpush3.bf16.msra.mxu1 %v2574_v35 }
 0x1d7   :  { %2181 = vmatprep.subr.bf16.mxu1 %v2292_v0 }
 0x1da   :  { %2183 = vmatpush3.bf16.msra.mxu1 %v2580_v43 }
 0x1db   :  { %2184 = vmatprep.subr.bf16.mxu1 %v2292_v0 }
 0x1de   :  { %2186 = vmatpush3.bf16.msra.mxu1 %v2586_v47 }
 0x1df   :  { %2187 = vmatprep.subr.bf16.mxu1 %v2292_v0 }
 0x1e2   :  { %2189 = vmatpush3.bf16.msra.mxu1 %v2592_v48 }
 0x1e3   :  { %2190 = vmatprep.subr.bf16.mxu1 %v2292_v0 }
 0x1e6   :  { %2192 = vmatpush3.bf16.msra.mxu1 %v2598_v54 }
 0x1e7   :  { %2193 = vmatprep.subr.bf16.mxu1 %v2292_v0 }
 0x1e9   :  { %1870 = vmatmul.mubr.f32.vlgmr.msra.gmra.mrb[0].mxu1 %v760_v63 }
 0x1ea   :  { %2195 = vmatpush3.bf16.msra.mxu1 %v2344_v12  ;;  %1904 = vmatprep.mubr.msk.f32.mxu1 %vm2293_vm0, %v2294_v4 }
 0x1eb   :  { %2196 = vmatprep.subr.bf16.mxu1 %v2292_v0 }
 0x1ee   :  { %2198 = vmatpush3.bf16.msra.mxu1 %v2347_v13 }
 0x1ef   :  { %2199 = vmatprep.subr.bf16.mxu1 %v2292_v0 }
 0x1f2   :  { %2201 = vmatpush3.bf16.msra.mxu1 %v2359_v18 }
 0x1f3   :  { %2202 = vmatprep.subr.bf16.mxu1 %v2292_v0 }
 0x1f6   :  { %2204 = vmatpush3.bf16.msra.mxu1 %v2397_v32 }
 0x1f7   :  { %2205 = vmatprep.subr.bf16.mxu1 %v2292_v0 }
 0x1fa   :  { %2207 = vmatpush3.bf16.msra.mxu1 %v2413_v44 }
 0x1fb   :  { %2208 = vmatprep.subr.bf16.mxu1 %v2292_v0 }
 0x1fe   :  { %2210 = vmatpush3.bf16.msra.mxu1 %v2424_v49 }
 0x1ff   :  { %2211 = vmatprep.subr.bf16.mxu1 %v2292_v0 }
 0x202   :  { %2213 = vmatpush3.bf16.msra.mxu1 %v2426_v50 }
 0x203   :  { %2214 = vmatprep.subr.bf16.mxu1 %v2292_v0 }
 0x206   :  { %2216 = vmatpush3.bf16.msra.mxu1 %v2428_v51 }
 0x207   :  { %2217 = vmatprep.subr.bf16.mxu1 %v2292_v0 }
 0x209   :  { %1905 = vmatmul.mubr.f32.vlgmr.msra.gmra.mrb[0].mxu1 %v761_v1 }
 0x20a   :  { %2219 = vmatpush3.bf16.msra.mxu1 %v2482_v27  ;;  %1939 = vmatprep.mubr.msk.f32.mxu1 %vm2293_vm0, %v2294_v4 }
 0x20b   :  { %2220 = vmatprep.subr.bf16.mxu1 %v2292_v0 }
 0x20e   :  { %2222 = vmatpush3.bf16.msra.mxu1 %v2484_v28 }
 0x20f   :  { %2223 = vmatprep.subr.bf16.mxu1 %v2292_v0 }
 0x212   :  { %2225 = vmatpush3.bf16.msra.mxu1 %v2486_v29 }
 0x213   :  { %2226 = vmatprep.subr.bf16.mxu1 %v2292_v0 }
 0x216   :  { %2228 = vmatpush3.bf16.msra.mxu1 %v2489_v30 }
 0x217   :  { %2229 = vmatprep.subr.bf16.mxu1 %v2292_v0 }
 0x21a   :  { %2231 = vmatpush3.bf16.msra.mxu1 %v2491_v33 }
 0x21b   :  { %2232 = vmatprep.subr.bf16.mxu1 %v2292_v0 }
 0x21e   :  { %2234 = vmatpush3.bf16.msra.mxu1 %v2493_v36 }
 0x21f   :  { %2235 = vmatprep.subr.bf16.mxu1 %v2292_v0 }
 0x222   :  { %2237 = vmatpush3.bf16.msra.mxu1 %v2495_v37 }
 0x223   :  { %2238 = vmatprep.subr.bf16.mxu1 %v2292_v0 }
 0x226   :  { %2240 = vmatpush3.bf16.msra.mxu1 %v2498_v38 }
 0x227   :  { %2241 = vmatprep.subr.bf16.mxu1 %v2292_v0 }
 0x229   :  { %1940 = vmatmul.mubr.f32.vlgmr.msra.gmra.mrb[0].mxu1 %v2666_v62 }
 0x22a   :  { %2243 = vmatpush3.bf16.msra.mxu1 %v2344_v12  ;;  %1974 = vmatprep.mubr.msk.f32.mxu1 %vm2293_vm0, %v2294_v4 }
 0x22b   :  { %2244 = vmatprep.subr.bf16.mxu1 %v2292_v0 }
 0x22e   :  { %2246 = vmatpush3.bf16.msra.mxu1 %v2347_v13 }
 0x22f   :  { %2247 = vmatprep.subr.bf16.mxu1 %v2292_v0 }
 0x232   :  { %2249 = vmatpush3.bf16.msra.mxu1 %v2359_v18 }
 0x233   :  { %2250 = vmatprep.subr.bf16.mxu1 %v2292_v0 }
 0x236   :  { %2252 = vmatpush3.bf16.msra.mxu1 %v2397_v32 }
 0x237   :  { %2253 = vmatprep.subr.bf16.mxu1 %v2292_v0 }
 0x23a   :  { %2255 = vmatpush3.bf16.msra.mxu1 %v2413_v44 }
 0x23b   :  { %2256 = vmatprep.subr.bf16.mxu1 %v2292_v0 }
 0x23e   :  { %2258 = vmatpush3.bf16.msra.mxu1 %v2424_v49 }
 0x23f   :  { %2259 = vmatprep.subr.bf16.mxu1 %v2292_v0 }
 0x242   :  { %2261 = vmatpush3.bf16.msra.mxu1 %v2426_v50 }
 0x243   :  { %2262 = vmatprep.subr.bf16.mxu1 %v2292_v0  ;;  %v1351_v0 = vld [vmem:[%s2773_s1] ss:$0 sm:$0xff] }
 0x246   :  { %2264 = vmatpush3.bf16.msra.mxu1 %v2428_v51 }
 0x249   :  { %1975 = vmatmul.mubr.f32.vlgmr.msra.gmra.mrb[0].mxu1 %v2666_v62 }
 0x31c   :  { %v1315_v4 = vpop.f32.mrb[0].mxu1 }
 0x31d   :  { %v1319_v12 = vmul.f32 0.032258064, %v1315_v4  ;;  %v1976_v13 = vpop.f32.mrb[1].mxu1 }
 0x31f   :  { %2288 = vrsqrt.f32 %v1319_v12  ;;  %vm1322_vm1 = vcmp.eq.f32.partialorder %v1319_v12, inf  ;;  %v1325_v31 = vand.u32 2147483648, %v1319_v12  ;;  %vm1324_vm2 = vcmp.eq.f32.partialorder %v1319_v12, 0.0 }
 0x329   :  { %v2289_v18 = vpop.eup %2288 }
 0x32a   :  { %v1321_v22 = vmul.f32 %v2289_v18, %v1319_v12 }
 0x32c   :  { %v1323_v32 = vsel %vm1322_vm1, %v1319_v12, %v1321_v22 }
 0x32d   :  { %v1326_v44 = vsel %vm1324_vm2, %v1325_v31, %v1323_v32 }
 0x32e   :  { %v1327_v49 = vadd.f32 1e-06, %v1326_v44 }
 0x330   :  { %2290 = vrcp.f32 %v1327_v49 }
 0x33a   :  { %v2291_v50 = vpop.eup %2290 }
 0x33b   :  { %v1329_v51 = vmul.f32 %v2291_v50, %v2662_v59 }
 0x33d   :  { %v1337_v9 = vmul.f32 %v1351_v0, %v1329_v51 }
 0x33f   :  { %v1345_v27 = vadd.f32 %v1352_v5, %v1337_v9 }
 0x341   :  { %1346 = vst [vmem:[%s2775_s4] sm:$0xff] %v1345_v27 }

</bundles_post_ra>
